<compile_context>
chip_gen: v5e
topology: v5e:2x2
jax: 0.10.0
libtpu: 0.0.40
codegen_flags: <defaults>
</compile_context>

<pallas_src>
import functools

import jax
import jax.numpy as jnp
from jax import lax
from jax.experimental import pallas as pl
from jax.experimental.pallas import tpu as pltpu

_LANES = 128
_ACC_SUBLANES = 8
_ROW_ALIGN = 32   # sublane alignment safe for f32/bf16/int8/fp8 packing


def _round_up(x, m):
    return ((x + m - 1) // m) * m


def _chip_config():
    """(num_core_splits, f32_tile_rows, vmem_limit_bytes) per TPU generation."""
    try:
        kind = jax.devices()[0].device_kind.lower()
    except Exception:
        kind = ""
    if "7" in kind:
        # v7x: 2 TensorCores/chip, only 64 MiB VMEM/TC -> 8 MiB f32 blocks,
        # 32 MiB double-buffered inputs, 48 MiB scoped limit leaves headroom.
        return 2, 16384, 48 * 1024 * 1024
    if "v4" in kind or "v5p" in kind:
        # Megacore chips with 128 MiB VMEM.
        return 2, 32768, 80 * 1024 * 1024
    # v5e / v6e: single TensorCore, 128 MiB VMEM -> 16 MiB f32 blocks.
    return 1, 32768, 80 * 1024 * 1024


def _mae_kernel(pred_ref, label_ref, out_ref, *,
                tile_rows, blocks_per_core, valid_rows):
    i = pl.program_id(1)

    @pl.when(i == 0)
    def _():
        out_ref[...] = jnp.zeros_like(out_ref)

    # Global row index of the first row of this (unclamped) block.
    blk = pl.program_id(0) * blocks_per_core + i
    row0 = blk * tile_rows

    def _accumulate(diff):
        # Partial reduce (tile_rows, 128) -> (8, 128): cross-vreg adds on the
        # VPU; the expensive cross-lane reduction is deferred to the wrapper.
        out_ref[0] += jnp.sum(
            diff.reshape(tile_rows // _ACC_SUBLANES, _ACC_SUBLANES, _LANES),
            axis=0)

    fully_valid = (row0 + tile_rows) <= valid_rows

    # Fast path: interior blocks, no masking work on the hot path.
    @pl.when(fully_valid)
    def _():
        _accumulate(jnp.abs(pred_ref[...].astype(jnp.float32)
                            - label_ref[...].astype(jnp.float32)))

    # Slow path: at most one ragged-tail / clamped-duplicate block per core.
    @pl.when(jnp.logical_not(fully_valid))
    def _():
        row_ids = row0 + lax.broadcasted_iota(jnp.int32, (tile_rows, 1), 0)
        diff = jnp.abs(pred_ref[...].astype(jnp.float32)
                       - label_ref[...].astype(jnp.float32))
        # Select (not multiply): padded rows may hold stale/NaN VMEM data.
        _accumulate(jnp.where(row_ids < valid_rows, diff, 0.0))


def mae(pred, label, *, tile_rows=None):
    assert pred.shape == label.shape, "pred/label shape mismatch"
    n_elems = pred.size
    if n_elems == 0:
        return jnp.float32(jnp.nan)   # torch.mean of empty tensor is nan

    num_splits, f32_rows, vmem_limit = _chip_config()
    item_bytes = jnp.dtype(pred.dtype).itemsize
    if tile_rows is None:
        # Dtype-scaled rows keep the DMA block at the same multi-MiB byte size
        # for narrow dtypes (bf16/int8/fp8).
        tile_rows = f32_rows * max(1, 4 // item_bytes)

    p = jnp.ravel(pred)
    l = jnp.ravel(label)

    rows = n_elems // _LANES
    aligned = rows * _LANES

    # Rare unaligned tail (<128 elems): reduce with plain jnp instead of a
    # full jnp.pad copy of both inputs.
    tail_sum = jnp.float32(0.0)
    if aligned != n_elems:
        tail_sum = jnp.sum(jnp.abs(p[aligned:].astype(jnp.float32)
                                   - l[aligned:].astype(jnp.float32)))
        p = p[:aligned]
        l = l[:aligned]

    if rows == 0:
        return tail_sum / jnp.float32(n_elems)

    p2 = p.reshape(rows, _LANES)
    l2 = l.reshape(rows, _LANES)

    # Row tile: multiple of 32 sublanes, capped near the row count so tiny
    # inputs don't allocate multi-MiB blocks.
    tr = min(_round_up(tile_rows, _ROW_ALIGN), _round_up(rows, _ROW_ALIGN))
    total_blocks = pl.cdiv(rows, tr)
    num_splits = min(num_splits, total_blocks)
    blocks_per_core = pl.cdiv(total_blocks, num_splits)
    grid = (num_splits, blocks_per_core)

    def in_map(c, i):
        # Clamp so a trailing core never addresses a fully out-of-range block
        # (its contribution is masked to zero inside the kernel).
        return (jnp.minimum(c * blocks_per_core + i, total_blocks - 1), 0)

    kernel = functools.partial(
        _mae_kernel, tile_rows=tr, blocks_per_core=blocks_per_core,
        valid_rows=rows)

    partials = pl.pallas_call(
        kernel,
        out_shape=jax.ShapeDtypeStruct(
            (num_splits, _ACC_SUBLANES, _LANES), jnp.float32),
        grid_spec=pltpu.PrefetchScalarGridSpec(
            num_scalar_prefetch=0,
            grid=grid,
            in_specs=[
                pl.BlockSpec((tr, _LANES), in_map),
                pl.BlockSpec((tr, _LANES), in_map),
            ],
            out_specs=pl.BlockSpec((1, _ACC_SUBLANES, _LANES),
                                   lambda c, i: (c, 0, 0)),
        ),
        compiler_params=pltpu.CompilerParams(
            dimension_semantics=("parallel", "arbitrary"),
            vmem_limit_bytes=vmem_limit,
        ),
        cost_estimate=pl.CostEstimate(
            flops=3 * n_elems,
            transcendentals=0,
            bytes_accessed=(2 * aligned * item_bytes
                            + num_splits * _ACC_SUBLANES * _LANES * 4)),
    )(p2, l2)

    # Tiny cross-lane reduce + mean over the TRUE element count.
    return (jnp.sum(partials) + tail_sum) / jnp.float32(n_elems)


if __name__ == "__main__":
    key = jax.random.PRNGKey(0)
    k1, k2, k3, k4 = jax.random.split(key, 4)

    # Lane-aligned case (2*4*16*16 = 2048 elements).
    pred = jax.random.normal(k1, (2, 4, 16, 16), dtype=jnp.float32)
    label = jax.random.normal(k2, (2, 4, 16, 16), dtype=jnp.float32)
    out = mae(pred, label)
    jax.block_until_ready(out)
    ref = jnp.mean(jnp.abs(pred - label))
    assert jnp.allclose(out, ref, rtol=1e-5, atol=1e-6), (out, ref)

    # Unaligned case (5*300 = 1500 elements -> 92-element jnp tail).
    pred_u = jax.random.normal(k3, (5, 300), dtype=jnp.float32)
    label_u = jax.random.normal(k4, (5, 300), dtype=jnp.float32)
    out_u = mae(pred_u, label_u)
    jax.block_until_ready(out_u)
    ref_u = jnp.mean(jnp.abs(pred_u - label_u))
    assert jnp.allclose(out_u, ref_u, rtol=1e-5, atol=1e-6), (out_u, ref_u)

    print("KERNEL_OK")
</pallas_src>

<mosaic_0001>
module attributes {stable_mosaic.version = 11 : i64} {
  func.func @_mae_kernel(%arg0: i32, %arg1: i32, %arg2: memref<32x128xf32, #tpu.memory_space<vmem>>, %arg3: memref<32x128xf32, #tpu.memory_space<vmem>>, %arg4: memref<1x8x128xf32, #tpu.memory_space<vmem>>) attributes {dimension_semantics = [#tpu.dimension_semantics<parallel>, #tpu.dimension_semantics<arbitrary>], iteration_bounds = array<i64: 1, 1>, scalar_prefetch = 0 : i64, scratch_operands = 0 : i64, tpu.core_type = #tpu.core_type<tc>, window_params = [{transform_indices = @transform_0, window_bounds = array<i64: 32, 128>}, {transform_indices = @transform_1, window_bounds = array<i64: 32, 128>}, {transform_indices = @transform_2, window_bounds = array<i64: 1, 8, 128>}]} {
    %c0_i32 = arith.constant 0 : i32
    %0 = arith.cmpi eq, %arg1, %c0_i32 : i32
    %1 = arith.extui %0 : i1 to i32
    %c0_i32_0 = arith.constant 0 : i32
    %2 = arith.cmpi ne, %1, %c0_i32_0 : i32
    scf.if %2 {
      %cst = arith.constant 0.000000e+00 : f32
      %13 = vector.broadcast %cst : f32 to vector<1x8x128xf32>
      %c0 = arith.constant 0 : index
      %c0_4 = arith.constant 0 : index
      %c0_5 = arith.constant 0 : index
      %14 = vector.load %arg4[%c0, %c0_4, %c0_5] : memref<1x8x128xf32, #tpu.memory_space<vmem>>, vector<1x8x128xf32>
      tpu.vector_store %arg4[%c0, %c0_4, %c0_5], %13 {strides = array<i32>} : memref<1x8x128xf32, #tpu.memory_space<vmem>>, vector<1x8x128xf32>,
    } else {
    }
    %c1_i32 = arith.constant 1 : i32
    %3 = arith.muli %arg0, %c1_i32 : i32
    %4 = arith.addi %3, %arg1 : i32
    %c32_i32 = arith.constant 32 : i32
    %5 = arith.muli %4, %c32_i32 : i32
    %c32_i32_1 = arith.constant 32 : i32
    %6 = arith.addi %5, %c32_i32_1 : i32
    %c16_i32 = arith.constant 16 : i32
    %7 = arith.cmpi sle, %6, %c16_i32 : i32
    %8 = arith.extui %7 : i1 to i32
    %c0_i32_2 = arith.constant 0 : i32
    %9 = arith.cmpi ne, %8, %c0_i32_2 : i32
    scf.if %9 {
      %c0 = arith.constant 0 : index
      %c0_4 = arith.constant 0 : index
      %13 = vector.load %arg2[%c0, %c0_4] : memref<32x128xf32, #tpu.memory_space<vmem>>, vector<32x128xf32>
      %c0_5 = arith.constant 0 : index
      %c0_6 = arith.constant 0 : index
      %14 = vector.load %arg3[%c0_5, %c0_6] : memref<32x128xf32, #tpu.memory_space<vmem>>, vector<32x128xf32>
      %15 = arith.subf %13, %14 : vector<32x128xf32>
      %16 = math.absf %15 : vector<32x128xf32>
      %c0_7 = arith.constant 0 : index
      %c0_8 = arith.constant 0 : index
      %c0_9 = arith.constant 0 : index
      %17 = vector.load %arg4[%c0_7, %c0_8, %c0_9] : memref<1x8x128xf32, #tpu.memory_space<vmem>>, vector<1x8x128xf32>
      %18 = vector.shape_cast %17 : vector<1x8x128xf32> to vector<8x128xf32>
      %19 = vector.shape_cast %16 : vector<32x128xf32> to vector<4x8x128xf32>
      %cst = arith.constant dense<0.000000e+00> : vector<8x128xf32>
      %20 = vector.multi_reduction <add>, %19, %cst [0] : vector<4x8x128xf32> to vector<8x128xf32>
      %21 = arith.addf %18, %20 : vector<8x128xf32>
      %c0_10 = arith.constant 0 : index
      %c0_11 = arith.constant 0 : index
      %c0_12 = arith.constant 0 : index
      %22 = vector.load %arg4[%c0_10, %c0_11, %c0_12] : memref<1x8x128xf32, #tpu.memory_space<vmem>>, vector<1x8x128xf32>
      %23 = vector.shape_cast %22 : vector<1x8x128xf32> to vector<8x128xf32>
      %24 = vector.shape_cast %21 : vector<8x128xf32> to vector<1x8x128xf32>
      tpu.vector_store %arg4[%c0_10, %c0_11, %c0_12], %24 {strides = array<i32>} : memref<1x8x128xf32, #tpu.memory_space<vmem>>, vector<1x8x128xf32>,
    } else {
    }
    %true = arith.constant true
    %10 = arith.xori %7, %true : i1
    %11 = arith.extui %10 : i1 to i32
    %c0_i32_3 = arith.constant 0 : i32
    %12 = arith.cmpi ne, %11, %c0_i32_3 : i32
    scf.if %12 {
      %13 = tpu.iota {dimensions = array<i32: 0>} : vector<32x1xi32>
      %14 = vector.broadcast %5 : i32 to vector<32x1xi32>
      %15 = arith.addi %14, %13 : vector<32x1xi32>
      %c0 = arith.constant 0 : index
      %c0_4 = arith.constant 0 : index
      %16 = vector.load %arg2[%c0, %c0_4] : memref<32x128xf32, #tpu.memory_space<vmem>>, vector<32x128xf32>
      %c0_5 = arith.constant 0 : index
      %c0_6 = arith.constant 0 : index
      %17 = vector.load %arg3[%c0_5, %c0_6] : memref<32x128xf32, #tpu.memory_space<vmem>>, vector<32x128xf32>
      %18 = arith.subf %16, %17 : vector<32x128xf32>
      %19 = math.absf %18 : vector<32x128xf32>
      %c16_i32_7 = arith.constant 16 : i32
      %20 = vector.broadcast %c16_i32_7 : i32 to vector<32x1xi32>
      %21 = arith.cmpi slt, %15, %20 : vector<32x1xi32>
      %cst = arith.constant 0.000000e+00 : f32
      %22 = vector.shape_cast %21 : vector<32x1xi1> to vector<32x1xi1>
      %23 = vector.broadcast %22 : vector<32x1xi1> to vector<32x128xi1>
      %24 = vector.broadcast %cst : f32 to vector<32x128xf32>
      %25 = arith.select %23, %19, %24 : vector<32x128xi1>, vector<32x128xf32>
      %c0_8 = arith.constant 0 : index
      %c0_9 = arith.constant 0 : index
      %c0_10 = arith.constant 0 : index
      %26 = vector.load %arg4[%c0_8, %c0_9, %c0_10] : memref<1x8x128xf32, #tpu.memory_space<vmem>>, vector<1x8x128xf32>
      %27 = vector.shape_cast %26 : vector<1x8x128xf32> to vector<8x128xf32>
      %28 = vector.shape_cast %25 : vector<32x128xf32> to vector<4x8x128xf32>
      %cst_11 = arith.constant dense<0.000000e+00> : vector<8x128xf32>
      %29 = vector.multi_reduction <add>, %28, %cst_11 [0] : vector<4x8x128xf32> to vector<8x128xf32>
      %30 = arith.addf %27, %29 : vector<8x128xf32>
      %c0_12 = arith.constant 0 : index
      %c0_13 = arith.constant 0 : index
      %c0_14 = arith.constant 0 : index
      %31 = vector.load %arg4[%c0_12, %c0_13, %c0_14] : memref<1x8x128xf32, #tpu.memory_space<vmem>>, vector<1x8x128xf32>
      %32 = vector.shape_cast %31 : vector<1x8x128xf32> to vector<8x128xf32>
      %33 = vector.shape_cast %30 : vector<8x128xf32> to vector<1x8x128xf32>
      tpu.vector_store %arg4[%c0_12, %c0_13, %c0_14], %33 {strides = array<i32>} : memref<1x8x128xf32, #tpu.memory_space<vmem>>, vector<1x8x128xf32>,
    } else {
    }
    return
  }
  func.func @transform_0(%arg0: i32, %arg1: i32) -> (i32, i32) {
    %c1_i32 = arith.constant 1 : i32
    %0 = arith.muli %arg0, %c1_i32 : i32
    %1 = arith.addi %0, %arg1 : i32
    %c0_i32 = arith.constant 0 : i32
    %2 = arith.minsi %1, %c0_i32 : i32
    %c0_i32_0 = arith.constant 0 : i32
    %c0_i32_1 = arith.constant 0 : i32
    return %2, %c0_i32_0 : i32, i32
  }
  func.func @transform_1(%arg0: i32, %arg1: i32) -> (i32, i32) {
    %c1_i32 = arith.constant 1 : i32
    %0 = arith.muli %arg0, %c1_i32 : i32
    %1 = arith.addi %0, %arg1 : i32
    %c0_i32 = arith.constant 0 : i32
    %2 = arith.minsi %1, %c0_i32 : i32
    %c0_i32_0 = arith.constant 0 : i32
    %c0_i32_1 = arith.constant 0 : i32
    return %2, %c0_i32_0 : i32, i32
  }
  func.func @transform_2(%arg0: i32, %arg1: i32) -> (i32, i32, i32) {
    %c0_i32 = arith.constant 0 : i32
    %c0_i32_0 = arith.constant 0 : i32
    %c0_i32_1 = arith.constant 0 : i32
    return %arg0, %c0_i32, %c0_i32_0 : i32, i32, i32
  }
}

</mosaic_0001>

<bundles_post_ra>
// kernel: tpu_custom_call.1
= control target key start
LH: loop header
LB: loop body
LE: loop exit
PB: predicated region body
PF: predicated region fallthrough
CT: control target
= control target key end

     0   :  { %7 = vsyncpa [#allocation3], 0  ;;  %s299_s0 = inlined_call_operand.hbm [shape: f32[16,128], index: 0, kind: input, shape index: {}]   ;;  %s300_s1 = inlined_call_operand.hbm [shape: f32[16,128], index: 1, kind: input, shape index: {}]   ;;  %s301_s2 = inlined_call_operand.hbm [shape: f32[1,8,128], index: 2, kind: output, shape index: {}]  }
   0x1   :  { %8 = vsyncpa [#allocation6], 0 }
   0x2   :  { %9 = vsyncpa [#allocation4], 0 }
   0x3   :  { %20 = vsyncadd [#allocation3], 256  ;;  %s25_s11 = sshll.u32 %s299_s0, 4  ;;  %s270_s12 = smov [#allocation2]   ;;  %s26_s11 = int_to_ptr.hbm [resolvable:$true] %s25_s11 }
   0x4   :  { %s27_s13 = sshll.u32 %s270_s12, 4  ;;  %s271_s14 = smov 128   ;;  %s28_s13 = int_to_ptr.vmem [resolvable:$true] %s27_s13 }
   0x5   :  { %s272_s15 = smov 8  }
   0x6   :  { %33 = dma.hbm_to_vmem [thread:$0]  %s26_s11, 256, %s28_s13, [#allocation3], %s271_s14, %s271_s14, %s272_s15  }
   0x7   :  { %44 = vsyncadd [#allocation6], 256  ;;  %s49_s18 = sshll.u32 %s300_s1, 4  ;;  %s273_s19 = smov [#allocation5]   ;;  %s50_s18 = int_to_ptr.hbm [resolvable:$true] %s49_s18 }
   0x8   :  { %s51_s20 = sshll.u32 %s273_s19, 4  ;;  %s52_s20 = int_to_ptr.vmem [resolvable:$true] %s51_s20 }
   0x9   :  { %57 = dma.hbm_to_vmem [thread:$0]  %s50_s18, 256, %s52_s20, [#allocation6], %s271_s14, %s271_s14, %s272_s15  }
   0xa   :  { %264 = dma.done.wait [#allocation3], 512  }
   0xb   :  { %265 = vsyncadd [#allocation3], 4294966784 }
   0xc   :  { %266 = dma.done.wait [#allocation6], 512  }
   0xd   :  { %267 = vsyncadd [#allocation6], 4294966784  ;;  %v126_v0 = vld [vmem:[#allocation2] sm:$0xff]  ;;  %v127_v1 = vld [vmem:[#allocation2 + $0x8] sm:$0xff]  ;;  %s274_s0 = smov [#allocation7]   ;;  %s171_s23 = sshll.u32 %s301_s2, 4  ;;  %s172_s23 = int_to_ptr.hbm [resolvable:$true] %s171_s23 }
   0xe   :  { %v130_v2 = vld [vmem:[#allocation5] sm:$0xff]  ;;  %v131_v3 = vld [vmem:[#allocation5 + $0x8] sm:$0xff]  ;;  %s169_s21 = sshll.u32 %s274_s0, 4  ;;  %s170_s21 = int_to_ptr.vmem [resolvable:$true] %s169_s21 }
   0xf   :  { %v134_v4 = vsub.f32 %v126_v0, %v130_v2  ;;  %v135_v5 = vsub.f32 %v127_v1, %v131_v3 }
  0x11   :  { %v138_v6 = vand.u32 2147483647, %v134_v4  ;;  %v139_v7 = vand.u32 2147483647, %v135_v5 }
  0x13   :  { %v159_v8 = vadd.f32 %v139_v7, %v138_v6 }
  0x15   :  { %163 = vst [vmem:[#allocation7] sm:$0xff] %v159_v8 }
  0x16   :  { %174 = dma.vmem_to_hbm [thread:$0]  %s170_s21, 128, %s172_s23, [#allocation4]  }
  0x17   :  { %268 = dma.done.wait [#allocation4], 128  }
  0x18   :  { %269 = vsyncadd [#allocation4], 4294967168 }
  0x19   :  { %179 = vsyncpa [#allocation3], 1 }
  0x1a   :  { %180 = vsyncpa [#allocation6], 1 }
  0x1b   :  { %181 = vsyncpa [#allocation4], 1 }

</bundles_post_ra>
